<compile_context>
chip_gen: v7x
topology: tpu7x:2x2x1
jax: 0.10.0
libtpu: 0.0.40
codegen_flags: <defaults>
</compile_context>

<pallas_src>
import functools

import jax
import jax.numpy as jnp
from jax.experimental import pallas as pl
from jax.experimental.pallas import tpu as pltpu


# ----------------------------------------------------------------------------
# Kernels
# ----------------------------------------------------------------------------


def _outconv_vpu_kernel(w_ref, b_ref, x_ref, o_ref):
    """VPU path for small channel counts, dense (rows, 128) channel planes.

    w_ref: SMEM (Cout, Cin)          b_ref: SMEM (Cout,)
    x_ref: VMEM (NB, Cin, R, 128)    o_ref: VMEM (NB, Cout, R, 128)
    """
    cin = x_ref.shape[1]
    cout = o_ref.shape[1]
    x = x_ref[...].astype(jnp.float32)  # full lane/sublane-dense block load
    for o in range(cout):
        acc = x[:, 0:1] * w_ref[o, 0]                 # (NB, 1, R, 128), dense vregs
        for c in range(1, cin):
            acc = acc + x[:, c:c + 1] * w_ref[o, c]
        # Dense, unmasked slab store of one output-channel plane.
        o_ref[:, pl.ds(o, 1)] = (acc + b_ref[o]).astype(o_ref.dtype)


def _outconv_mxu_kernel(w_ref, b_ref, x_ref, o_ref, *, precision):
    """MXU path for larger channel counts.

    w_ref: VMEM (Cout, Cin)   b_ref: VMEM (Cout, 1)
    x_ref: VMEM (Cin, T)      o_ref: VMEM (Cout, T)   (T = spatial tile, lane axis)
    """
    acc = jnp.dot(w_ref[...], x_ref[...],
                  preferred_element_type=jnp.float32,
                  precision=precision)
    o_ref[...] = (acc + b_ref[...].astype(jnp.float32)).astype(o_ref.dtype)


# ----------------------------------------------------------------------------
# Tiling heuristics
# ----------------------------------------------------------------------------


def _round_up(x, m):
    return ((x + m - 1) // m) * m


def _pick_batch_fold(n, per_batch_bytes, target_bytes):
    """Largest divisor of n whose folded HBM traffic stays within target_bytes."""
    cap = max(int(target_bytes // max(per_batch_bytes, 1)), 1)
    nb = min(n, cap)
    while n % nb:
        nb -= 1
    return nb


def _pick_rows_tile(rows, batch_tiles, bytes_per_row, target_bytes):
    """Rows-of-128 tile: multiple of 8 (or full extent), sized for target HBM bytes."""
    if rows <= 8:
        return rows
    want = max(target_bytes // max(bytes_per_row, 1), 8)
    num_tiles = max(-(-rows // want), 1)
    if batch_tiles == 1 and rows >= 16:
        num_tiles = max(num_tiles, 2)       # let v7x's second TensorCore get work
    tile = _round_up(-(-rows // num_tiles), 8)
    return rows if tile >= rows else tile


def _pick_hw_tile(hw, batch_tiles, bytes_per_lane, target_bytes):
    """Flat spatial tile: multiple of 128 (or full extent), sized for target bytes."""
    if hw <= 128:
        return hw
    want = max((target_bytes // max(bytes_per_lane, 1)) // 128 * 128, 128)
    num_tiles = max(-(-hw // want), 1)
    if batch_tiles == 1 and hw >= 256:
        num_tiles = max(num_tiles, 2)
    tile = _round_up(-(-hw // num_tiles), 128)
    return hw if tile >= hw else tile


# ----------------------------------------------------------------------------
# Wrapper
# ----------------------------------------------------------------------------


def out_conv(x_nchw, weight, bias, *, target_step_bytes=4 << 20):
    """1x1 Conv2d forward (PyTorch OutConv semantics).

    x_nchw: (N, Cin, H, W)
    weight: (Cout, Cin, 1, 1)   -- PyTorch Conv2d weight layout
    bias:   (Cout,)
    returns: (N, Cout, H, W), same dtype as x.
    """
    N, Cin, H, W = x_nchw.shape
    Cout = weight.shape[0]
    HW = H * W
    itemsize = x_nchw.dtype.itemsize
    in_is_f32 = x_nchw.dtype == jnp.float32

    w2d = weight.reshape(Cout, Cin)

    # Roofline-aware routing: dense-plane VPU math stays HBM-bound roughly while
    # Cin*Cout <= ~8*(Cin+Cout) (conservative across v5e/v6e/v7x); otherwise MXU.
    use_vpu = (HW % 128 == 0) and (Cin * Cout <= min(8 * (Cin + Cout), 256))

    cost = pl.CostEstimate(
        flops=2 * N * HW * Cin * Cout,
        transcendentals=0,
        bytes_accessed=(N * Cin * HW + N * Cout * HW) * itemsize
        + (Cout * Cin + Cout) * 4,
    )

    if use_vpu:
        rows = HW // 128
        x4d = x_nchw.reshape(N, Cin, rows, 128)        # free reshape, no transpose

        per_batch_bytes = (Cin + Cout) * HW * itemsize
        nb = _pick_batch_fold(N, per_batch_bytes, target_step_bytes)
        bytes_per_row = nb * (Cin + Cout) * 128 * itemsize
        rows_tile = _pick_rows_tile(rows, N // nb, bytes_per_row, target_step_bytes)

        grid = (N // nb, pl.cdiv(rows, rows_tile))
        x_spec = pl.BlockSpec((nb, Cin, rows_tile, 128), lambda b, r: (b, 0, r, 0))
        o_spec = pl.BlockSpec((nb, Cout, rows_tile, 128), lambda b, r: (b, 0, r, 0))
        w_spec = pl.BlockSpec(memory_space=pltpu.MemorySpace.SMEM)
        b_spec = pl.BlockSpec(memory_space=pltpu.MemorySpace.SMEM)

        kernel = _outconv_vpu_kernel
        w_arg = w2d.astype(jnp.float32)                # (Cout, Cin) scalars in SMEM
        b_arg = bias.astype(jnp.float32)               # (Cout,)     scalars in SMEM
        out_shape = jax.ShapeDtypeStruct((N, Cout, rows, 128), x_nchw.dtype)

        footprint = 2 * nb * (Cin + Cout) * rows_tile * 128 * itemsize
    else:
        x3d = x_nchw.reshape(N, Cin, HW)               # free reshape, no transpose

        bytes_per_lane = (Cin + Cout) * itemsize
        tile = _pick_hw_tile(HW, N, bytes_per_lane, target_step_bytes)

        grid = (N, pl.cdiv(HW, tile))
        x_spec = pl.BlockSpec((None, Cin, tile), lambda n, s: (n, 0, s))
        o_spec = pl.BlockSpec((None, Cout, tile), lambda n, s: (n, 0, s))
        w_spec = pl.BlockSpec((Cout, Cin), lambda n, s: (0, 0))
        b_spec = pl.BlockSpec((Cout, 1), lambda n, s: (0, 0))

        if in_is_f32:
            # f32 parity with PyTorch Conv2d (extra MXU passes hide under DMA).
            precision = jax.lax.Precision.HIGHEST
            w_arg = w2d.astype(jnp.float32)
        else:
            # bf16 inputs take the MXU's native bf16 path with f32 accumulation.
            precision = None
            w_arg = w2d.astype(x_nchw.dtype)
        kernel = functools.partial(_outconv_mxu_kernel, precision=precision)
        b_arg = bias.astype(jnp.float32).reshape(Cout, 1)
        out_shape = jax.ShapeDtypeStruct((N, Cout, HW), x_nchw.dtype)

        footprint = (2 * (Cin + Cout) * tile * itemsize
                     + 2 * (Cout * Cin + Cout) * w_arg.dtype.itemsize)
        x4d = x3d

    # Explicit VMEM budget: actual double-buffered footprint + headroom, capped so
    # it is safe on every generation (v7x has only 64 MiB physical VMEM).
    vmem_limit = int(min(max(2 * footprint + (4 << 20), 16 << 20), 48 << 20))

    out = pl.pallas_call(
        kernel,
        out_shape=out_shape,
        grid_spec=pltpu.PrefetchScalarGridSpec(
            num_scalar_prefetch=0,
            grid=grid,
            in_specs=[w_spec, b_spec, x_spec],
            out_specs=o_spec,
        ),
        compiler_params=pltpu.CompilerParams(
            dimension_semantics=("parallel", "parallel"),
            vmem_limit_bytes=vmem_limit,
        ),
        cost_estimate=cost,
    )(w_arg, b_arg, x4d)

    return out.reshape(N, Cout, H, W)


# ----------------------------------------------------------------------------
# Self-test
# ----------------------------------------------------------------------------

if __name__ == "__main__":
    key = jax.random.PRNGKey(0)
    keys = jax.random.split(key, 9)

    # 1) Small OutConv (dense-plane VPU path): batch=2, 4 -> 3 channels, 16x16.
    N, Cin, Cout, H, W = 2, 4, 3, 16, 16
    bound = 1.0 / (Cin ** 0.5)
    x = jax.random.normal(keys[0], (N, Cin, H, W), dtype=jnp.float32)
    weight = jax.random.uniform(keys[1], (Cout, Cin, 1, 1), jnp.float32, -bound, bound)
    bias = jax.random.uniform(keys[2], (Cout,), jnp.float32, -bound, bound)

    out = out_conv(x, weight, bias)
    jax.block_until_ready(out)
    ref = jnp.einsum("nchw,oc->nohw", x, weight.reshape(Cout, Cin),
                     precision=jax.lax.Precision.HIGHEST) + bias[None, :, None, None]
    assert out.shape == (N, Cout, H, W)
    assert jnp.allclose(out, ref, atol=1e-5, rtol=1e-5)

    # 2) Large-channel case (MXU path): 128 -> 128 channels, 8x16 spatial.
    N2, Cin2, Cout2, H2, W2 = 1, 128, 128, 8, 16
    bound2 = 1.0 / (Cin2 ** 0.5)
    x2 = jax.random.normal(keys[3], (N2, Cin2, H2, W2), dtype=jnp.float32)
    weight2 = jax.random.uniform(keys[4], (Cout2, Cin2, 1, 1), jnp.float32, -bound2, bound2)
    bias2 = jax.random.uniform(keys[5], (Cout2,), jnp.float32, -bound2, bound2)

    out2 = out_conv(x2, weight2, bias2)
    jax.block_until_ready(out2)
    ref2 = jnp.einsum("nchw,oc->nohw", x2, weight2.reshape(Cout2, Cin2),
                      precision=jax.lax.Precision.HIGHEST) + bias2[None, :, None, None]
    assert out2.shape == (N2, Cout2, H2, W2)
    assert jnp.allclose(out2, ref2, atol=1e-4, rtol=1e-4)

    # 3) Small channels but HW not a multiple of 128 (MXU fallback): 4 -> 3, 10x10.
    N3, Cin3, Cout3, H3, W3 = 2, 4, 3, 10, 10
    bound3 = 1.0 / (Cin3 ** 0.5)
    x3 = jax.random.normal(keys[6], (N3, Cin3, H3, W3), dtype=jnp.float32)
    weight3 = jax.random.uniform(keys[7], (Cout3, Cin3, 1, 1), jnp.float32, -bound3, bound3)
    bias3 = jax.random.uniform(keys[8], (Cout3,), jnp.float32, -bound3, bound3)

    out3 = out_conv(x3, weight3, bias3)
    jax.block_until_ready(out3)
    ref3 = jnp.einsum("nchw,oc->nohw", x3, weight3.reshape(Cout3, Cin3),
                      precision=jax.lax.Precision.HIGHEST) + bias3[None, :, None, None]
    assert out3.shape == (N3, Cout3, H3, W3)
    assert jnp.allclose(out3, ref3, atol=1e-5, rtol=1e-5)

    print("KERNEL_OK")
</pallas_src>

<mosaic_0001>
module attributes {stable_mosaic.version = 11 : i64} {
  func.func @_outconv_vpu_kernel(%arg0: i32, %arg1: i32, %arg2: memref<3x4xf32, #tpu.memory_space<smem>>, %arg3: memref<3xf32, #tpu.memory_space<smem>>, %arg4: memref<2x4x2x128xf32, #tpu.memory_space<vmem>>, %arg5: memref<2x3x2x128xf32, #tpu.memory_space<vmem>>) attributes {dimension_semantics = [#tpu.dimension_semantics<parallel>, #tpu.dimension_semantics<parallel>], iteration_bounds = array<i64: 1, 1>, scalar_prefetch = 0 : i64, scratch_operands = 0 : i64, tpu.core_type = #tpu.core_type<tc>, window_params = [{transform_indices = @transform_0, window_bounds = array<i64: 3, 4>}, {transform_indices = @transform_1, window_bounds = array<i64: 3>}, {transform_indices = @transform_2, window_bounds = array<i64: 2, 4, 2, 128>}, {transform_indices = @transform_3, window_bounds = array<i64: 2, 3, 2, 128>}]} {
    %c0 = arith.constant 0 : index
    %c0_0 = arith.constant 0 : index
    %c0_1 = arith.constant 0 : index
    %c0_2 = arith.constant 0 : index
    %0 = vector.load %arg4[%c0, %c0_0, %c0_1, %c0_2] : memref<2x4x2x128xf32, #tpu.memory_space<vmem>>, vector<2x4x2x128xf32>
    %1 = vector.extract_strided_slice %0 {offsets = [0, 0, 0, 0], sizes = [2, 1, 2, 128], strides = [1, 1, 1, 1]} : vector<2x4x2x128xf32> to vector<2x1x2x128xf32>
    %c0_3 = arith.constant 0 : index
    %c0_4 = arith.constant 0 : index
    %2 = memref.load %arg2[%c0_3, %c0_4] : memref<3x4xf32, #tpu.memory_space<smem>>
    %3 = vector.broadcast %2 : f32 to vector<2x1x2x128xf32>
    %4 = arith.mulf %1, %3 : vector<2x1x2x128xf32>
    %5 = vector.extract_strided_slice %0 {offsets = [0, 1, 0, 0], sizes = [2, 1, 2, 128], strides = [1, 1, 1, 1]} : vector<2x4x2x128xf32> to vector<2x1x2x128xf32>
    %c0_5 = arith.constant 0 : index
    %c1 = arith.constant 1 : index
    %6 = memref.load %arg2[%c0_5, %c1] : memref<3x4xf32, #tpu.memory_space<smem>>
    %7 = vector.broadcast %6 : f32 to vector<2x1x2x128xf32>
    %8 = arith.mulf %5, %7 : vector<2x1x2x128xf32>
    %9 = arith.addf %4, %8 : vector<2x1x2x128xf32>
    %10 = vector.extract_strided_slice %0 {offsets = [0, 2, 0, 0], sizes = [2, 1, 2, 128], strides = [1, 1, 1, 1]} : vector<2x4x2x128xf32> to vector<2x1x2x128xf32>
    %c0_6 = arith.constant 0 : index
    %c2 = arith.constant 2 : index
    %11 = memref.load %arg2[%c0_6, %c2] : memref<3x4xf32, #tpu.memory_space<smem>>
    %12 = vector.broadcast %11 : f32 to vector<2x1x2x128xf32>
    %13 = arith.mulf %10, %12 : vector<2x1x2x128xf32>
    %14 = arith.addf %9, %13 : vector<2x1x2x128xf32>
    %15 = vector.extract_strided_slice %0 {offsets = [0, 3, 0, 0], sizes = [2, 1, 2, 128], strides = [1, 1, 1, 1]} : vector<2x4x2x128xf32> to vector<2x1x2x128xf32>
    %c0_7 = arith.constant 0 : index
    %c3 = arith.constant 3 : index
    %16 = memref.load %arg2[%c0_7, %c3] : memref<3x4xf32, #tpu.memory_space<smem>>
    %17 = vector.broadcast %16 : f32 to vector<2x1x2x128xf32>
    %18 = arith.mulf %15, %17 : vector<2x1x2x128xf32>
    %19 = arith.addf %14, %18 : vector<2x1x2x128xf32>
    %c0_8 = arith.constant 0 : index
    %20 = memref.load %arg3[%c0_8] : memref<3xf32, #tpu.memory_space<smem>>
    %21 = vector.broadcast %20 : f32 to vector<2x1x2x128xf32>
    %22 = arith.addf %19, %21 : vector<2x1x2x128xf32>
    %c0_9 = arith.constant 0 : index
    %c0_10 = arith.constant 0 : index
    %c0_11 = arith.constant 0 : index
    %c0_12 = arith.constant 0 : index
    %23 = vector.load %arg5[%c0_9, %c0_10, %c0_11, %c0_12] : memref<2x3x2x128xf32, #tpu.memory_space<vmem>>, vector<2x1x2x128xf32>
    tpu.vector_store %arg5[%c0_9, %c0_10, %c0_11, %c0_12], %22 {strides = array<i32>} : memref<2x3x2x128xf32, #tpu.memory_space<vmem>>, vector<2x1x2x128xf32>,
    %24 = vector.extract_strided_slice %0 {offsets = [0, 0, 0, 0], sizes = [2, 1, 2, 128], strides = [1, 1, 1, 1]} : vector<2x4x2x128xf32> to vector<2x1x2x128xf32>
    %c1_13 = arith.constant 1 : index
    %c0_14 = arith.constant 0 : index
    %25 = memref.load %arg2[%c1_13, %c0_14] : memref<3x4xf32, #tpu.memory_space<smem>>
    %26 = vector.broadcast %25 : f32 to vector<2x1x2x128xf32>
    %27 = arith.mulf %24, %26 : vector<2x1x2x128xf32>
    %28 = vector.extract_strided_slice %0 {offsets = [0, 1, 0, 0], sizes = [2, 1, 2, 128], strides = [1, 1, 1, 1]} : vector<2x4x2x128xf32> to vector<2x1x2x128xf32>
    %c1_15 = arith.constant 1 : index
    %c1_16 = arith.constant 1 : index
    %29 = memref.load %arg2[%c1_15, %c1_16] : memref<3x4xf32, #tpu.memory_space<smem>>
    %30 = vector.broadcast %29 : f32 to vector<2x1x2x128xf32>
    %31 = arith.mulf %28, %30 : vector<2x1x2x128xf32>
    %32 = arith.addf %27, %31 : vector<2x1x2x128xf32>
    %33 = vector.extract_strided_slice %0 {offsets = [0, 2, 0, 0], sizes = [2, 1, 2, 128], strides = [1, 1, 1, 1]} : vector<2x4x2x128xf32> to vector<2x1x2x128xf32>
    %c1_17 = arith.constant 1 : index
    %c2_18 = arith.constant 2 : index
    %34 = memref.load %arg2[%c1_17, %c2_18] : memref<3x4xf32, #tpu.memory_space<smem>>
    %35 = vector.broadcast %34 : f32 to vector<2x1x2x128xf32>
    %36 = arith.mulf %33, %35 : vector<2x1x2x128xf32>
    %37 = arith.addf %32, %36 : vector<2x1x2x128xf32>
    %38 = vector.extract_strided_slice %0 {offsets = [0, 3, 0, 0], sizes = [2, 1, 2, 128], strides = [1, 1, 1, 1]} : vector<2x4x2x128xf32> to vector<2x1x2x128xf32>
    %c1_19 = arith.constant 1 : index
    %c3_20 = arith.constant 3 : index
    %39 = memref.load %arg2[%c1_19, %c3_20] : memref<3x4xf32, #tpu.memory_space<smem>>
    %40 = vector.broadcast %39 : f32 to vector<2x1x2x128xf32>
    %41 = arith.mulf %38, %40 : vector<2x1x2x128xf32>
    %42 = arith.addf %37, %41 : vector<2x1x2x128xf32>
    %c1_21 = arith.constant 1 : index
    %43 = memref.load %arg3[%c1_21] : memref<3xf32, #tpu.memory_space<smem>>
    %44 = vector.broadcast %43 : f32 to vector<2x1x2x128xf32>
    %45 = arith.addf %42, %44 : vector<2x1x2x128xf32>
    %c0_22 = arith.constant 0 : index
    %c1_23 = arith.constant 1 : index
    %c0_24 = arith.constant 0 : index
    %c0_25 = arith.constant 0 : index
    %46 = vector.load %arg5[%c0_22, %c1_23, %c0_24, %c0_25] : memref<2x3x2x128xf32, #tpu.memory_space<vmem>>, vector<2x1x2x128xf32>
    tpu.vector_store %arg5[%c0_22, %c1_23, %c0_24, %c0_25], %45 {strides = array<i32>} : memref<2x3x2x128xf32, #tpu.memory_space<vmem>>, vector<2x1x2x128xf32>,
    %47 = vector.extract_strided_slice %0 {offsets = [0, 0, 0, 0], sizes = [2, 1, 2, 128], strides = [1, 1, 1, 1]} : vector<2x4x2x128xf32> to vector<2x1x2x128xf32>
    %c2_26 = arith.constant 2 : index
    %c0_27 = arith.constant 0 : index
    %48 = memref.load %arg2[%c2_26, %c0_27] : memref<3x4xf32, #tpu.memory_space<smem>>
    %49 = vector.broadcast %48 : f32 to vector<2x1x2x128xf32>
    %50 = arith.mulf %47, %49 : vector<2x1x2x128xf32>
    %51 = vector.extract_strided_slice %0 {offsets = [0, 1, 0, 0], sizes = [2, 1, 2, 128], strides = [1, 1, 1, 1]} : vector<2x4x2x128xf32> to vector<2x1x2x128xf32>
    %c2_28 = arith.constant 2 : index
    %c1_29 = arith.constant 1 : index
    %52 = memref.load %arg2[%c2_28, %c1_29] : memref<3x4xf32, #tpu.memory_space<smem>>
    %53 = vector.broadcast %52 : f32 to vector<2x1x2x128xf32>
    %54 = arith.mulf %51, %53 : vector<2x1x2x128xf32>
    %55 = arith.addf %50, %54 : vector<2x1x2x128xf32>
    %56 = vector.extract_strided_slice %0 {offsets = [0, 2, 0, 0], sizes = [2, 1, 2, 128], strides = [1, 1, 1, 1]} : vector<2x4x2x128xf32> to vector<2x1x2x128xf32>
    %c2_30 = arith.constant 2 : index
    %c2_31 = arith.constant 2 : index
    %57 = memref.load %arg2[%c2_30, %c2_31] : memref<3x4xf32, #tpu.memory_space<smem>>
    %58 = vector.broadcast %57 : f32 to vector<2x1x2x128xf32>
    %59 = arith.mulf %56, %58 : vector<2x1x2x128xf32>
    %60 = arith.addf %55, %59 : vector<2x1x2x128xf32>
    %61 = vector.extract_strided_slice %0 {offsets = [0, 3, 0, 0], sizes = [2, 1, 2, 128], strides = [1, 1, 1, 1]} : vector<2x4x2x128xf32> to vector<2x1x2x128xf32>
    %c2_32 = arith.constant 2 : index
    %c3_33 = arith.constant 3 : index
    %62 = memref.load %arg2[%c2_32, %c3_33] : memref<3x4xf32, #tpu.memory_space<smem>>
    %63 = vector.broadcast %62 : f32 to vector<2x1x2x128xf32>
    %64 = arith.mulf %61, %63 : vector<2x1x2x128xf32>
    %65 = arith.addf %60, %64 : vector<2x1x2x128xf32>
    %c2_34 = arith.constant 2 : index
    %66 = memref.load %arg3[%c2_34] : memref<3xf32, #tpu.memory_space<smem>>
    %67 = vector.broadcast %66 : f32 to vector<2x1x2x128xf32>
    %68 = arith.addf %65, %67 : vector<2x1x2x128xf32>
    %c0_35 = arith.constant 0 : index
    %c2_36 = arith.constant 2 : index
    %c0_37 = arith.constant 0 : index
    %c0_38 = arith.constant 0 : index
    %69 = vector.load %arg5[%c0_35, %c2_36, %c0_37, %c0_38] : memref<2x3x2x128xf32, #tpu.memory_space<vmem>>, vector<2x1x2x128xf32>
    tpu.vector_store %arg5[%c0_35, %c2_36, %c0_37, %c0_38], %68 {strides = array<i32>} : memref<2x3x2x128xf32, #tpu.memory_space<vmem>>, vector<2x1x2x128xf32>,
    return
  }
  func.func @transform_0(%arg0: i32, %arg1: i32) -> (i32, i32) {
    %c0_i32 = arith.constant 0 : i32
    %c0_i32_0 = arith.constant 0 : i32
    %c0_i32_1 = arith.constant 0 : i32
    return %c0_i32, %c0_i32_0 : i32, i32
  }
  func.func @transform_1(%arg0: i32, %arg1: i32) -> i32 {
    %c0_i32 = arith.constant 0 : i32
    %c0_i32_0 = arith.constant 0 : i32
    return %c0_i32 : i32
  }
  func.func @transform_2(%arg0: i32, %arg1: i32) -> (i32, i32, i32, i32) {
    %c0_i32 = arith.constant 0 : i32
    %c0_i32_0 = arith.constant 0 : i32
    %c0_i32_1 = arith.constant 0 : i32
    return %arg0, %c0_i32, %arg1, %c0_i32_0 : i32, i32, i32, i32
  }
  func.func @transform_3(%arg0: i32, %arg1: i32) -> (i32, i32, i32, i32) {
    %c0_i32 = arith.constant 0 : i32
    %c0_i32_0 = arith.constant 0 : i32
    %c0_i32_1 = arith.constant 0 : i32
    return %arg0, %c0_i32, %arg1, %c0_i32_0 : i32, i32, i32, i32
  }
}

</mosaic_0001>

<bundles_post_ra>
// kernel: tpu_custom_call.1
= control target key start
LH: loop header
LB: loop body
LE: loop exit
PB: predicated region body
PF: predicated region fallthrough
CT: control target
= control target key end

     0   :  { %8 = vsyncpa [#allocation5], 0  ;;  %s381_s0 = inlined_call_operand.hbm [shape: f32[3,4], index: 0, kind: input, shape index: {}]   ;;  %s382_s1 = inlined_call_operand.vmem [shape: f32[3], index: 1, kind: input, shape index: {}]   ;;  %s383_s2 = inlined_call_operand.hbm [shape: f32[2,4,2,128], index: 2, kind: input, shape index: {}]   ;;  %s384_s3 = inlined_call_operand.hbm [shape: f32[2,3,2,128], index: 3, kind: output, shape index: {}]  }
   0x1   :  { %9 = vsyncpa [#allocation6], 0 }
   0x2   :  { %10 = vsyncpa [#allocation3], 0 }
   0x3   :  { %11 = vsyncpa [#allocation4], 0  ;;  %s26_s14 = sshll.u32 %s382_s1, 4  ;;  %s184_s17 = scalar_lea.hbm %s381_s0, 64  ;;  %s27_s14 = int_to_ptr.vmem [resolvable:$true] %s26_s14 }
   0x4   :  { %p185_p0 = scmp.ne.s32.totalorder %s381_s0, %s184_s17  ;;  %p188_p1 = scmp.lt.u32.totalorder %s184_s17, %s381_s0 }
   0x6   :  { %p190_p2 = pnand %p188_p1, %p185_p0 }
   0x8   :  { %193 = shalt.err (!%p190_p2)
}
   0x9   :  { %s258_s22 = smov [#allocation2]   ;;  %s194_s1 = scalar_lea.vmem %s27_s14, 16 }
   0xa   :  { %19 = dma.hbm_to_smem %s381_s0, 64, %s258_s22, [#allocation5]  }
   0xb   :  { %p195_p3 = scmp.ne.s32.totalorder %s27_s14, %s194_s1  ;;  %p199_p4 = scmp.lt.s32.totalorder %s27_s14, %s27_s14 }
   0xc   :  { %p200_p5 = scmp.lt.s32.totalorder %s194_s1, %s194_s1 }
   0xe   :  { %p201_p6 = por %p200_p5, %p199_p4 }
  0x10   :  { %p202_p7 = pnand %p201_p6, %p195_p3 }
  0x12   :  { %205 = shalt.err (!%p202_p7)
}
  0x13   :  { %s259_s25 = smov [#allocation7]   ;;  %s260_s26 = smov [#allocation8]  }
  0x14   :  { %29 = dma.vmem_to_smem %s27_s14, 16, %s259_s25, [#allocation6]  }
  0x15   :  { %s35_s27 = sshll.u32 %s260_s26, 4  ;;  %s206_s30 = scalar_lea.hbm %s383_s2, 256  ;;  %s36_s27 = int_to_ptr.vmem [resolvable:$true] %s35_s27 }
  0x16   :  { %p207_p8 = scmp.ne.s32.totalorder %s383_s2, %s206_s30  ;;  %p210_p9 = scmp.lt.u32.totalorder %s206_s30, %s383_s2 }
  0x18   :  { %p212_p10 = pnand %p210_p9, %p207_p8 }
  0x1a   :  { %215 = shalt.err (!%p212_p10)
}
  0x1b   :  { %s216_s7 = scalar_lea.vmem %s36_s27, 256  ;;  %p221_p12 = scmp.lt.s32.totalorder %s36_s27, %s36_s27 }
  0x1c   :  { %p217_p11 = scmp.ne.s32.totalorder %s36_s27, %s216_s7  ;;  %p222_p13 = scmp.lt.s32.totalorder %s216_s7, %s216_s7 }
  0x1e   :  { %p223_p0 = por %p222_p13, %p221_p12 }
  0x20   :  { %p224_p1 = pnand %p223_p0, %p217_p11 }
  0x22   :  { %227 = shalt.err (!%p224_p1)
}
  0x23   :  { %s261_s8 = smov 32   ;;  %s262_s9 = smov 2  }
  0x24   :  { %41 = dma.hbm_to_vmem [thread:$0]  %s383_s2, 256, %s36_s27, [#allocation3], %s261_s8, %s261_s8, %s262_s9  }
  0x25   :  { %250 = dma.done.wait [#allocation5], 64  }
  0x26   :  { %251 = vsyncadd [#allocation5], 4294967232 }
  0x27   :  { %252 = dma.done.wait [#allocation6], 16  }
  0x28   :  { %253 = vsyncadd [#allocation6], 4294967280 }
  0x29   :  { %254 = dma.done.wait [#allocation3], 256  }
  0x2a   :  { %255 = vsyncadd [#allocation3], 4294967040 }
  0x2b   :  { %51 = sfence }
  0x2c   :  { %s60_s12 = sld [smem:[#allocation2]]  ;;  %s314_s13 = sld [smem:[#allocation2 + $0x1]]  ;;  %v52_v0 = vld [vmem:[#allocation8] sm:$0x3]  ;;  %v53_v1 = vld [vmem:[#allocation8 + $0x2] sm:$0x3] }
  0x2d   :  { %s316_s14 = sld [smem:[#allocation2 + $0x2]]  ;;  %s318_s15 = sld [smem:[#allocation2 + $0x3]]  ;;  %v54_v2 = vld [vmem:[#allocation8 + $0x4] sm:$0x3]  ;;  %v322_v3 = vld [vmem:[#allocation8 + $0x6] sm:$0x3] }
  0x2e   :  { %s320_s16 = sld [smem:[#allocation7]]  ;;  %s326_s17 = sld [smem:[#allocation2 + $0x81]]  ;;  %v56_v4 = vld [vmem:[#allocation8 + $0x8] sm:$0x3]  ;;  %v57_v5 = vld [vmem:[#allocation8 + $0xa] sm:$0x3] }
  0x2f   :  { %s324_s2 = sld [smem:[#allocation2 + $0x80]]  ;;  %s328_s18 = sld [smem:[#allocation2 + $0x82]]  ;;  %v58_v6 = vld [vmem:[#allocation8 + $0xc] sm:$0x3]  ;;  %v335_v9 = vld [vmem:[#allocation8 + $0xe] sm:$0x3] }
  0x30   :  { %s330_s19 = sld [smem:[#allocation2 + $0x83]]  ;;  %s332_s20 = sld [smem:[#allocation7 + $0x1]] }
  0x31   :  { %s337_s21 = sld [smem:[#allocation2 + $0x100]]  ;;  %s339_s22 = sld [smem:[#allocation2 + $0x101]] }
  0x32   :  { %v61_v7 = vstv %s60_s12  ;;  %v65_v8 = vstv %s314_s13  ;;  %s345_s23 = sld [smem:[#allocation2 + $0x102]]  ;;  %s347_s24 = sld [smem:[#allocation2 + $0x103]] }
  0x33   :  { %v62_v10 = vmul.f32 %v61_v7, %v52_v0  ;;  %v66_v11 = vmul.f32 %v65_v8, %v53_v1  ;;  %v71_v12 = vstv %s316_s14  ;;  %v77_v13 = vstv %s318_s15  ;;  %s356_s1 = sld [smem:[#allocation7 + $0x2]]  ;;  %s263_s25 = smov [#allocation9]  }
  0x34   :  { %v72_v14 = vmul.f32 %v71_v12, %v54_v2  ;;  %v78_v15 = vmul.f32 %v77_v13, %v322_v3  ;;  %v83_v16 = vstv %s320_s16  ;;  %v63_v17 = vmul.f32 %v61_v7, %v56_v4  ;;  %s151_s26 = sshll.u32 %s263_s25, 4  ;;  %s152_s26 = int_to_ptr.vmem [resolvable:$true] %s151_s26 }
  0x35   :  { %v68_v18 = vadd.f32 %v66_v11, %v62_v10  ;;  %v67_v19 = vmul.f32 %v65_v8, %v57_v5  ;;  %v73_v20 = vmul.f32 %v71_v12, %v58_v6  ;;  %v79_v21 = vmul.f32 %v77_v13, %v335_v9  ;;  %s228_s27 = scalar_lea.vmem %s152_s26, 192  ;;  %p233_p3 = scmp.lt.s32.totalorder %s152_s26, %s152_s26 }
  0x36   :  { %v89_v22 = vstv %s324_s2  ;;  %v93_v23 = vstv %s326_s17  ;;  %v99_v24 = vstv %s328_s18  ;;  %v105_v25 = vstv %s330_s19  ;;  %p229_p2 = scmp.ne.s32.totalorder %s152_s26, %s228_s27  ;;  %p234_p4 = scmp.lt.s32.totalorder %s228_s27, %s228_s27 }
  0x37   :  { %v74_v26 = vadd.f32 %v72_v14, %v68_v18  ;;  %v69_v27 = vadd.f32 %v67_v19, %v63_v17  ;;  %v90_v28 = vmul.f32 %v89_v22, %v52_v0  ;;  %v94_v29 = vmul.f32 %v93_v23, %v53_v1 }
  0x38   :  { %v100_v30 = vmul.f32 %v99_v24, %v54_v2  ;;  %v106_v31 = vmul.f32 %v105_v25, %v322_v3  ;;  %v111_v32 = vstv %s332_s20  ;;  %v91_v33 = vmul.f32 %v89_v22, %v56_v4  ;;  %p235_p5 = por %p234_p4, %p233_p3 }
  0x39   :  { %v80_v34 = vadd.f32 %v78_v15, %v74_v26  ;;  %v75_v35 = vadd.f32 %v73_v20, %v69_v27  ;;  %v96_v36 = vadd.f32 %v94_v29, %v90_v28  ;;  %v95_v37 = vmul.f32 %v93_v23, %v57_v5 }
  0x3a   :  { %v101_v38 = vmul.f32 %v99_v24, %v58_v6  ;;  %v107_v39 = vmul.f32 %v105_v25, %v335_v9  ;;  %v118_v40 = vstv %s337_s21  ;;  %v122_v41 = vstv %s339_s22  ;;  %p236_p6 = pnand %p235_p5, %p229_p2 }
  0x3b   :  { %v84_v42 = vadd.f32 %v83_v16, %v80_v34  ;;  %v81_v43 = vadd.f32 %v79_v21, %v75_v35  ;;  %v102_v44 = vadd.f32 %v100_v30, %v96_v36  ;;  %v97_v45 = vadd.f32 %v95_v37, %v91_v33 }
  0x3c   :  { %v119_v46 = vmul.f32 %v118_v40, %v52_v0  ;;  %v123_v47 = vmul.f32 %v122_v41, %v53_v1  ;;  %v128_v48 = vstv %s345_s23  ;;  %v134_v49 = vstv %s347_s24 }
  0x3d   :  { %86 = vst [vmem:[#allocation9] sm:$0x3] %v84_v42  ;;  %v85_v50 = vadd.f32 %v83_v16, %v81_v43  ;;  %v108_v51 = vadd.f32 %v106_v31, %v102_v44  ;;  %v103_v52 = vadd.f32 %v101_v38, %v97_v45  ;;  %v129_v53 = vmul.f32 %v128_v48, %v54_v2 }
  0x3e   :  { %v125_v54 = vadd.f32 %v123_v47, %v119_v46  ;;  %v135_v55 = vmul.f32 %v134_v49, %v322_v3  ;;  %v120_v56 = vmul.f32 %v118_v40, %v56_v4  ;;  %v124_v59 = vmul.f32 %v122_v41, %v57_v5 }
  0x3f   :  { %87 = vst [vmem:[#allocation9 + $0x6] sm:$0x3] %v85_v50  ;;  %v112_v57 = vadd.f32 %v111_v32, %v108_v51  ;;  %v109_v58 = vadd.f32 %v107_v39, %v103_v52  ;;  %v130_v60 = vmul.f32 %v128_v48, %v58_v6  ;;  %v140_v63 = vstv %s356_s1 }
  0x40   :  { %v131_v61 = vadd.f32 %v129_v53, %v125_v54  ;;  %v126_v0 = vadd.f32 %v124_v59, %v120_v56  ;;  %v136_v1 = vmul.f32 %v134_v49, %v335_v9 }
  0x41   :  { %115 = vst [vmem:[#allocation9 + $0x2] sm:$0x3] %v112_v57  ;;  %v113_v62 = vadd.f32 %v111_v32, %v109_v58 }
  0x42   :  { %v137_v7 = vadd.f32 %v135_v55, %v131_v61  ;;  %v132_v8 = vadd.f32 %v130_v60, %v126_v0 }
  0x43   :  { %116 = vst [vmem:[#allocation9 + $0x8] sm:$0x3] %v113_v62 }
  0x44   :  { %v141_v2 = vadd.f32 %v140_v63, %v137_v7  ;;  %v138_v3 = vadd.f32 %v136_v1, %v132_v8 }
  0x46   :  { %144 = vst [vmem:[#allocation9 + $0x4] sm:$0x3] %v141_v2  ;;  %v142_v4 = vadd.f32 %v140_v63, %v138_v3 }
  0x48   :  { %145 = vst [vmem:[#allocation9 + $0xa] sm:$0x3] %v142_v4 }
  0x49   :  { %239 = shalt.err (!%p236_p6)
}
  0x4a   :  { %s240_s30 = scalar_lea.hbm %s384_s3, 192 }
  0x4b   :  { %p241_p7 = scmp.ne.s32.totalorder %s384_s3, %s240_s30  ;;  %p244_p8 = scmp.lt.u32.totalorder %s240_s30, %s384_s3 }
  0x4d   :  { %p246_p9 = pnand %p244_p8, %p241_p7 }
  0x4f   :  { %249 = shalt.err (!%p246_p9)
}
  0x50   :  { %157 = dma.vmem_to_hbm [thread:$0]  %s152_s26, 192, %s384_s3, [#allocation4], %s261_s8, %s261_s8, %s262_s9  }
  0x51   :  { %256 = dma.done.wait [#allocation4], 192  }
  0x52   :  { %257 = vsyncadd [#allocation4], 4294967104 }
  0x53   :  { %161 = vsyncpa [#allocation3], 1 }
  0x54   :  { %162 = vsyncpa [#allocation4], 1 }
  0x55   :  { %163 = vsyncpa [#allocation5], 1 }
  0x56   :  { %164 = vsyncpa [#allocation6], 1 }

</bundles_post_ra>
